<compile_context>
chip_gen: v7x
topology: tpu7x:2x2x1
jax: 0.10.0
libtpu: 0.0.40
codegen_flags: <defaults>
</compile_context>

<pallas_src>
import functools

import jax
import jax.numpy as jnp
from jax import lax
from jax.experimental import pallas as pl
from jax.experimental.pallas import tpu as pltpu

# Model hyper-parameters (small, consistent with the module's __init__).
VOCAB = 64
EMB = 32
HID = 32
NUM_CLASSES = 6
PAD_ID = 0
BATCH = 2
SEQ = 8

# Packed-parameter-blob layout (rows x 256 lanes, f32).
GATE_W = 8 * HID                    # 256 lanes: [r_f|r_b|z_f|z_b|n_f|n_b|pad|pad]
OUT_LANES = 128                     # lane-padded logits width
OFF_TAB = 0                         # (2*VOCAB, GATE_W): fused emb@W_ih + b_ih,
                                    #   rows [0:V) fwd block, [V:2V) bwd block
OFF_WHH = OFF_TAB + 2 * VOCAB       # (2*HID, GATE_W): block-diag W_hh (fwd|bwd)
OFF_WFC = OFF_WHH + 2 * HID         # (2*HID, GATE_W): FC weight in lanes [0:128)
OFF_BIAS = OFF_WFC + 2 * HID        # (8, GATE_W): row 0 = b_hh, row 1 = b_fc
ROW_BHH = OFF_BIAS
ROW_BFC = OFF_BIAS + 1
PARAM_ROWS = OFF_BIAS + 8           # 264


def tweet_gru_kernel(tok_ref,       # (T*B, 2) int32: (token[b,t], token[b,T-1-t]) at row t*B+b
                     par_ref,       # (PARAM_ROWS, GATE_W) f32 packed parameter blob
                     out_ref,       # (B, OUT_LANES) f32 lane-padded logits
                     *, T, B, H, V):
    W = 8 * H

    # ---- Hoisted loop invariants: block-diag W_hh + broadcast b_hh. ----
    whh = par_ref[OFF_WHH:OFF_WHH + 2 * H, :]                        # (2H, W)
    bhh = jnp.broadcast_to(par_ref[ROW_BHH:ROW_BHH + 1, :], (B, W))  # (B, W)

    # ---- All input-projection pre-activations in ONE matmul (off the serial
    # chain).  One-hot rows select the fwd table block with token[b,t] and the
    # bwd table block with token[b,T-1-t]; b_ih is folded into the table. ----
    tok = tok_ref[...]                                               # (T*B, 2)
    iota = lax.broadcasted_iota(jnp.int32, (T * B, 2 * V), 1)
    onehot = jnp.logical_or(iota == tok[:, 0:1],
                            iota == tok[:, 1:2] + V).astype(jnp.float32)
    gx_all = jnp.dot(onehot, par_ref[OFF_TAB:OFF_TAB + 2 * V, :],
                     preferred_element_type=jnp.float32)             # (T*B, W)

    # ---- Serial recurrence: fwd & bwd fused in one (B,2H)@(2H,W) dot/step.
    # Lane layout [r_f|r_b|z_f|z_b|n_f|n_b|pad] -> one sigmoid for both
    # directions' r|z, one tanh for both n's, no per-direction concats. ----
    h = jnp.zeros((B, 2 * H), jnp.float32)                           # [h_f | h_b]
    for t in range(T):                                               # T=8, static unroll
        gx = gx_all[t * B:(t + 1) * B, :]                            # (B, W), sublane-aligned
        gh = jnp.dot(h, whh, preferred_element_type=jnp.float32) + bhh
        rz = jax.nn.sigmoid(gx[:, 0:4 * H] + gh[:, 0:4 * H])         # (B, 4H)
        r = rz[:, 0:2 * H]                                           # [r_f | r_b]
        z = rz[:, 2 * H:4 * H]                                       # [z_f | z_b]
        n = jnp.tanh(gx[:, 4 * H:6 * H] + r * gh[:, 4 * H:6 * H])    # b_hn scaled by r
        h = (1.0 - z) * n + z * h

    # ---- FC over [h_fwd_final | h_bwd_final]; lane-dense (B,128) store.
    # Dropout(p=0.5) is identity in eval mode. ----
    wfc = par_ref[OFF_WFC:OFF_WFC + 2 * H, 0:OUT_LANES]              # (2H, 128)
    bfc = par_ref[ROW_BFC:ROW_BFC + 1, 0:OUT_LANES]                  # (1, 128)
    out = jnp.dot(h, wfc, preferred_element_type=jnp.float32) + bfc
    out_ref[...] = out.astype(out_ref.dtype)


def prepare_fused_params(raw):
    """One-time parameter transform: build the packed (PARAM_ROWS, 256) blob."""
    f32 = jnp.float32
    H, V, C = HID, VOCAB, NUM_CLASSES

    def scatter(mat, d):
        # (R, 3H) PyTorch gate order [r|z|n] for direction d (0=f, 1=b) ->
        # (R, GATE_W) lane layout [r_f|r_b|z_f|z_b|n_f|n_b|pad]; pad lanes zero.
        out = jnp.zeros((mat.shape[0], GATE_W), f32)
        for g in range(3):
            out = out.at[:, (2 * g + d) * H:(2 * g + d + 1) * H].set(
                mat[:, g * H:(g + 1) * H].astype(f32))
        return out

    # Fused embedding x input-projection tables (b_ih folded in); padded row
    # (emb == 0) correctly yields gx == b_ih.
    tab_f = raw["emb"] @ raw["wih_f"] + raw["bih_f"]                 # (V, 3H)
    tab_b = raw["emb"] @ raw["wih_b"] + raw["bih_b"]                 # (V, 3H)
    tab = jnp.concatenate([scatter(tab_f, 0), scatter(tab_b, 1)], axis=0)   # (2V, W)
    whh = jnp.concatenate([scatter(raw["whh_f"], 0),
                           scatter(raw["whh_b"], 1)], axis=0)        # (2H, W) block-diag
    bhh = scatter(raw["bhh_f"], 0) + scatter(raw["bhh_b"], 1)        # (1, W)

    wfc = jnp.zeros((2 * H, GATE_W), f32).at[:, :C].set(raw["wfc"].astype(f32))
    bfc = jnp.zeros((1, GATE_W), f32).at[:, :C].set(raw["bfc"].astype(f32))
    bias_rows = jnp.zeros((8, GATE_W), f32).at[0].set(bhh[0]).at[1].set(bfc[0])

    blob = jnp.concatenate([tab, whh, wfc, bias_rows], axis=0)       # (PARAM_ROWS, W)
    assert blob.shape == (PARAM_ROWS, GATE_W)
    return blob


def tweet_emotion_gru_forward(x_tokens, params_blob):
    """x_tokens: (B, T) int32 token ids. Returns (B, NUM_CLASSES) logits."""
    B, T = x_tokens.shape
    Bp = ((B + 7) // 8) * 8                     # full-sublane batch (pad with PAD seqs)
    x_pad = jnp.pad(x_tokens.astype(jnp.int32), ((0, Bp - B), (0, 0)),
                    constant_values=PAD_ID)
    # Time-major token pairs: row t*Bp + b = (token[b, t], token[b, T-1-t]).
    tok2 = jnp.stack([x_pad.T.reshape(-1), x_pad[:, ::-1].T.reshape(-1)], axis=1)

    kernel = functools.partial(tweet_gru_kernel, T=T, B=Bp, H=HID, V=VOCAB)
    vmem = pl.BlockSpec(memory_space=pltpu.MemorySpace.VMEM)

    out = pl.pallas_call(
        kernel,
        out_shape=jax.ShapeDtypeStruct((Bp, OUT_LANES), jnp.float32),
        in_specs=[vmem, vmem],
        out_specs=vmem,
    )(tok2, params_blob)
    return out[:B, :NUM_CLASSES]


def make_params(key):
    """Deterministic synthetic parameter init (PyTorch-shaped, pre-transposed)."""
    ks = jax.random.split(key, 12)
    scale = 0.1

    def rnd(k, shape):
        return (scale * jax.random.normal(k, shape)).astype(jnp.float32)

    emb = rnd(ks[0], (VOCAB, EMB))
    emb = emb.at[PAD_ID].set(0.0)                                # padding_idx row = 0

    # PyTorch GRU weights are (3H, E)/(3H, H); stored transposed for x @ W.
    return {
        "emb": emb,
        "wih_f": rnd(ks[1], (EMB, 3 * HID)),
        "whh_f": rnd(ks[2], (HID, 3 * HID)),
        "bih_f": rnd(ks[3], (1, 3 * HID)),
        "bhh_f": rnd(ks[4], (1, 3 * HID)),
        "wih_b": rnd(ks[5], (EMB, 3 * HID)),
        "whh_b": rnd(ks[6], (HID, 3 * HID)),
        "bih_b": rnd(ks[7], (1, 3 * HID)),
        "bhh_b": rnd(ks[8], (1, 3 * HID)),
        "wfc": rnd(ks[9], (2 * HID, NUM_CLASSES)),               # Linear weight^T
        "bfc": rnd(ks[10], (1, NUM_CLASSES)),
    }


def _gru_cell_ref(x_t, h, w_ih, w_hh, b_ih, b_hh, H):
    """PyTorch-semantics GRU step (unfused reference)."""
    gx = x_t @ w_ih + b_ih
    gh = h @ w_hh + b_hh
    r = jax.nn.sigmoid(gx[:, 0 * H:1 * H] + gh[:, 0 * H:1 * H])
    z = jax.nn.sigmoid(gx[:, 1 * H:2 * H] + gh[:, 1 * H:2 * H])
    n = jnp.tanh(gx[:, 2 * H:3 * H] + r * gh[:, 2 * H:3 * H])
    return (1.0 - z) * n + z * h


def reference_forward(x_tokens, raw):
    """Pure-JAX reference mirroring torch.nn.GRU (bidirectional) semantics."""
    e = jnp.take(raw["emb"], x_tokens, axis=0).astype(jnp.float32)   # (B,T,E)
    B, T, _ = e.shape

    def run_dir(seq, wih, whh, bih, bhh):
        h = jnp.zeros((B, HID), jnp.float32)
        for t in range(T):
            h = _gru_cell_ref(seq[:, t, :], h, wih, whh, bih, bhh, HID)
        return h

    h_f = run_dir(e, raw["wih_f"], raw["whh_f"], raw["bih_f"], raw["bhh_f"])
    h_b = run_dir(e[:, ::-1, :], raw["wih_b"], raw["whh_b"],
                  raw["bih_b"], raw["bhh_b"])
    h = jnp.concatenate([h_f, h_b], axis=1)
    return h @ raw["wfc"] + raw["bfc"]


if __name__ == "__main__":
    key = jax.random.PRNGKey(0)
    k_x, k_p = jax.random.split(key)

    x = jax.random.randint(k_x, (BATCH, SEQ), 0, VOCAB, dtype=jnp.int32)
    x = x.at[0, -2:].set(PAD_ID)          # include some padding tokens

    raw = make_params(k_p)
    blob = prepare_fused_params(raw)      # one-time prep, not per-call

    out = tweet_emotion_gru_forward(x, blob)
    out = jax.block_until_ready(out)

    ref = reference_forward(x, raw)
    assert out.shape == (BATCH, NUM_CLASSES)
    # Tolerance leaves headroom for MXU multi-pass f32 matmul rounding; any
    # structural/layout bug would be orders of magnitude larger.
    assert jnp.allclose(out, ref, atol=1e-4, rtol=1e-4), (out, ref)

    print("KERNEL_OK")
</pallas_src>

<mosaic_0001>
module attributes {stable_mosaic.version = 11 : i64} {
  func.func @tweet_gru_kernel(%arg0: memref<64x2xi32, #tpu.memory_space<vmem>>, %arg1: memref<264x256xf32, #tpu.memory_space<vmem>>, %arg2: memref<8x128xf32, #tpu.memory_space<vmem>>) attributes {dimension_semantics = [], scalar_prefetch = 0 : i64, scratch_operands = 0 : i64, tpu.core_type = #tpu.core_type<tc>} {
    %c128 = arith.constant 128 : index
    %c0 = arith.constant 0 : index
    %0 = vector.load %arg1[%c128, %c0] : memref<264x256xf32, #tpu.memory_space<vmem>>, vector<64x256xf32>
    %c256 = arith.constant 256 : index
    %c0_0 = arith.constant 0 : index
    %1 = vector.load %arg1[%c256, %c0_0] : memref<264x256xf32, #tpu.memory_space<vmem>>, vector<1x256xf32>
    %2 = vector.shape_cast %1 : vector<1x256xf32> to vector<1x256xf32>
    %3 = vector.broadcast %2 : vector<1x256xf32> to vector<8x256xf32>
    %c0_1 = arith.constant 0 : index
    %c0_2 = arith.constant 0 : index
    %4 = vector.load %arg0[%c0_1, %c0_2] : memref<64x2xi32, #tpu.memory_space<vmem>>, vector<64x2xi32>
    %5 = tpu.iota {dimensions = array<i32: 1>} : vector<64x128xi32>
    %6 = vector.extract_strided_slice %4 {offsets = [0, 0], sizes = [64, 1], strides = [1, 1]} : vector<64x2xi32> to vector<64x1xi32>
    %7 = vector.broadcast %6 : vector<64x1xi32> to vector<64x128xi32>
    %8 = arith.cmpi eq, %5, %7 : vector<64x128xi32>
    %9 = vector.extract_strided_slice %4 {offsets = [0, 1], sizes = [64, 1], strides = [1, 1]} : vector<64x2xi32> to vector<64x1xi32>
    %c64_i32 = arith.constant 64 : i32
    %10 = vector.broadcast %c64_i32 : i32 to vector<64x1xi32>
    %11 = arith.addi %9, %10 : vector<64x1xi32>
    %12 = vector.broadcast %11 : vector<64x1xi32> to vector<64x128xi32>
    %13 = arith.cmpi eq, %5, %12 : vector<64x128xi32>
    %14 = arith.ori %8, %13 : vector<64x128xi1>
    %15 = arith.extui %14 : vector<64x128xi1> to vector<64x128xi32>
    %16 = arith.sitofp %15 : vector<64x128xi32> to vector<64x128xf32>
    %c0_3 = arith.constant 0 : index
    %c0_4 = arith.constant 0 : index
    %17 = vector.load %arg1[%c0_3, %c0_4] : memref<264x256xf32, #tpu.memory_space<vmem>>, vector<128x256xf32>
    %cst = arith.constant dense<0.000000e+00> : vector<64x256xf32>
    %18 = tpu.matmul %16, %17, %cst {dimension_numbers = #tpu.dot_dimension_numbers<[1], [0], [0], [1], [0, 0, 1, 1], [], []>} : vector<64x128xf32>, vector<128x256xf32>, vector<64x256xf32> -> vector<64x256xf32>
    %cst_5 = arith.constant 0.000000e+00 : f32
    %19 = vector.broadcast %cst_5 : f32 to vector<8x64xf32>
    %20 = vector.extract_strided_slice %18 {offsets = [0, 0], sizes = [8, 256], strides = [1, 1]} : vector<64x256xf32> to vector<8x256xf32>
    %cst_6 = arith.constant dense<0.000000e+00> : vector<8x256xf32>
    %21 = tpu.matmul %19, %0, %cst_6 {dimension_numbers = #tpu.dot_dimension_numbers<[1], [0], [0], [1], [0, 0, 1, 1], [], []>} : vector<8x64xf32>, vector<64x256xf32>, vector<8x256xf32> -> vector<8x256xf32>
    %22 = arith.addf %21, %3 : vector<8x256xf32>
    %23 = vector.extract_strided_slice %20 {offsets = [0, 0], sizes = [8, 128], strides = [1, 1]} : vector<8x256xf32> to vector<8x128xf32>
    %24 = vector.extract_strided_slice %22 {offsets = [0, 0], sizes = [8, 128], strides = [1, 1]} : vector<8x256xf32> to vector<8x128xf32>
    %25 = arith.addf %23, %24 : vector<8x128xf32>
    %26 = arith.negf %25 : vector<8x128xf32>
    %27 = math.exp %26 : vector<8x128xf32>
    %cst_7 = arith.constant 1.000000e+00 : f32
    %28 = vector.broadcast %cst_7 : f32 to vector<8x128xf32>
    %29 = arith.addf %28, %27 : vector<8x128xf32>
    %30 = arith.divf %28, %29 : vector<8x128xf32>
    %31 = vector.extract_strided_slice %30 {offsets = [0, 0], sizes = [8, 64], strides = [1, 1]} : vector<8x128xf32> to vector<8x64xf32>
    %32 = vector.extract_strided_slice %30 {offsets = [0, 64], sizes = [8, 64], strides = [1, 1]} : vector<8x128xf32> to vector<8x64xf32>
    %33 = vector.extract_strided_slice %20 {offsets = [0, 128], sizes = [8, 64], strides = [1, 1]} : vector<8x256xf32> to vector<8x64xf32>
    %34 = vector.extract_strided_slice %22 {offsets = [0, 128], sizes = [8, 64], strides = [1, 1]} : vector<8x256xf32> to vector<8x64xf32>
    %35 = arith.mulf %31, %34 : vector<8x64xf32>
    %36 = arith.addf %33, %35 : vector<8x64xf32>
    %37 = math.tanh %36 : vector<8x64xf32>
    %cst_8 = arith.constant 1.000000e+00 : f32
    %38 = vector.broadcast %cst_8 : f32 to vector<8x64xf32>
    %39 = arith.subf %38, %32 : vector<8x64xf32>
    %40 = arith.mulf %39, %37 : vector<8x64xf32>
    %41 = arith.mulf %32, %19 : vector<8x64xf32>
    %42 = arith.addf %40, %41 : vector<8x64xf32>
    %43 = vector.extract_strided_slice %18 {offsets = [8, 0], sizes = [8, 256], strides = [1, 1]} : vector<64x256xf32> to vector<8x256xf32>
    %cst_9 = arith.constant dense<0.000000e+00> : vector<8x256xf32>
    %44 = tpu.matmul %42, %0, %cst_9 {dimension_numbers = #tpu.dot_dimension_numbers<[1], [0], [0], [1], [0, 0, 1, 1], [], []>} : vector<8x64xf32>, vector<64x256xf32>, vector<8x256xf32> -> vector<8x256xf32>
    %45 = arith.addf %44, %3 : vector<8x256xf32>
    %46 = vector.extract_strided_slice %43 {offsets = [0, 0], sizes = [8, 128], strides = [1, 1]} : vector<8x256xf32> to vector<8x128xf32>
    %47 = vector.extract_strided_slice %45 {offsets = [0, 0], sizes = [8, 128], strides = [1, 1]} : vector<8x256xf32> to vector<8x128xf32>
    %48 = arith.addf %46, %47 : vector<8x128xf32>
    %49 = arith.negf %48 : vector<8x128xf32>
    %50 = math.exp %49 : vector<8x128xf32>
    %cst_10 = arith.constant 1.000000e+00 : f32
    %51 = vector.broadcast %cst_10 : f32 to vector<8x128xf32>
    %52 = arith.addf %51, %50 : vector<8x128xf32>
    %53 = arith.divf %51, %52 : vector<8x128xf32>
    %54 = vector.extract_strided_slice %53 {offsets = [0, 0], sizes = [8, 64], strides = [1, 1]} : vector<8x128xf32> to vector<8x64xf32>
    %55 = vector.extract_strided_slice %53 {offsets = [0, 64], sizes = [8, 64], strides = [1, 1]} : vector<8x128xf32> to vector<8x64xf32>
    %56 = vector.extract_strided_slice %43 {offsets = [0, 128], sizes = [8, 64], strides = [1, 1]} : vector<8x256xf32> to vector<8x64xf32>
    %57 = vector.extract_strided_slice %45 {offsets = [0, 128], sizes = [8, 64], strides = [1, 1]} : vector<8x256xf32> to vector<8x64xf32>
    %58 = arith.mulf %54, %57 : vector<8x64xf32>
    %59 = arith.addf %56, %58 : vector<8x64xf32>
    %60 = math.tanh %59 : vector<8x64xf32>
    %cst_11 = arith.constant 1.000000e+00 : f32
    %61 = vector.broadcast %cst_11 : f32 to vector<8x64xf32>
    %62 = arith.subf %61, %55 : vector<8x64xf32>
    %63 = arith.mulf %62, %60 : vector<8x64xf32>
    %64 = arith.mulf %55, %42 : vector<8x64xf32>
    %65 = arith.addf %63, %64 : vector<8x64xf32>
    %66 = vector.extract_strided_slice %18 {offsets = [16, 0], sizes = [8, 256], strides = [1, 1]} : vector<64x256xf32> to vector<8x256xf32>
    %cst_12 = arith.constant dense<0.000000e+00> : vector<8x256xf32>
    %67 = tpu.matmul %65, %0, %cst_12 {dimension_numbers = #tpu.dot_dimension_numbers<[1], [0], [0], [1], [0, 0, 1, 1], [], []>} : vector<8x64xf32>, vector<64x256xf32>, vector<8x256xf32> -> vector<8x256xf32>
    %68 = arith.addf %67, %3 : vector<8x256xf32>
    %69 = vector.extract_strided_slice %66 {offsets = [0, 0], sizes = [8, 128], strides = [1, 1]} : vector<8x256xf32> to vector<8x128xf32>
    %70 = vector.extract_strided_slice %68 {offsets = [0, 0], sizes = [8, 128], strides = [1, 1]} : vector<8x256xf32> to vector<8x128xf32>
    %71 = arith.addf %69, %70 : vector<8x128xf32>
    %72 = arith.negf %71 : vector<8x128xf32>
    %73 = math.exp %72 : vector<8x128xf32>
    %cst_13 = arith.constant 1.000000e+00 : f32
    %74 = vector.broadcast %cst_13 : f32 to vector<8x128xf32>
    %75 = arith.addf %74, %73 : vector<8x128xf32>
    %76 = arith.divf %74, %75 : vector<8x128xf32>
    %77 = vector.extract_strided_slice %76 {offsets = [0, 0], sizes = [8, 64], strides = [1, 1]} : vector<8x128xf32> to vector<8x64xf32>
    %78 = vector.extract_strided_slice %76 {offsets = [0, 64], sizes = [8, 64], strides = [1, 1]} : vector<8x128xf32> to vector<8x64xf32>
    %79 = vector.extract_strided_slice %66 {offsets = [0, 128], sizes = [8, 64], strides = [1, 1]} : vector<8x256xf32> to vector<8x64xf32>
    %80 = vector.extract_strided_slice %68 {offsets = [0, 128], sizes = [8, 64], strides = [1, 1]} : vector<8x256xf32> to vector<8x64xf32>
    %81 = arith.mulf %77, %80 : vector<8x64xf32>
    %82 = arith.addf %79, %81 : vector<8x64xf32>
    %83 = math.tanh %82 : vector<8x64xf32>
    %cst_14 = arith.constant 1.000000e+00 : f32
    %84 = vector.broadcast %cst_14 : f32 to vector<8x64xf32>
    %85 = arith.subf %84, %78 : vector<8x64xf32>
    %86 = arith.mulf %85, %83 : vector<8x64xf32>
    %87 = arith.mulf %78, %65 : vector<8x64xf32>
    %88 = arith.addf %86, %87 : vector<8x64xf32>
    %89 = vector.extract_strided_slice %18 {offsets = [24, 0], sizes = [8, 256], strides = [1, 1]} : vector<64x256xf32> to vector<8x256xf32>
    %cst_15 = arith.constant dense<0.000000e+00> : vector<8x256xf32>
    %90 = tpu.matmul %88, %0, %cst_15 {dimension_numbers = #tpu.dot_dimension_numbers<[1], [0], [0], [1], [0, 0, 1, 1], [], []>} : vector<8x64xf32>, vector<64x256xf32>, vector<8x256xf32> -> vector<8x256xf32>
    %91 = arith.addf %90, %3 : vector<8x256xf32>
    %92 = vector.extract_strided_slice %89 {offsets = [0, 0], sizes = [8, 128], strides = [1, 1]} : vector<8x256xf32> to vector<8x128xf32>
    %93 = vector.extract_strided_slice %91 {offsets = [0, 0], sizes = [8, 128], strides = [1, 1]} : vector<8x256xf32> to vector<8x128xf32>
    %94 = arith.addf %92, %93 : vector<8x128xf32>
    %95 = arith.negf %94 : vector<8x128xf32>
    %96 = math.exp %95 : vector<8x128xf32>
    %cst_16 = arith.constant 1.000000e+00 : f32
    %97 = vector.broadcast %cst_16 : f32 to vector<8x128xf32>
    %98 = arith.addf %97, %96 : vector<8x128xf32>
    %99 = arith.divf %97, %98 : vector<8x128xf32>
    %100 = vector.extract_strided_slice %99 {offsets = [0, 0], sizes = [8, 64], strides = [1, 1]} : vector<8x128xf32> to vector<8x64xf32>
    %101 = vector.extract_strided_slice %99 {offsets = [0, 64], sizes = [8, 64], strides = [1, 1]} : vector<8x128xf32> to vector<8x64xf32>
    %102 = vector.extract_strided_slice %89 {offsets = [0, 128], sizes = [8, 64], strides = [1, 1]} : vector<8x256xf32> to vector<8x64xf32>
    %103 = vector.extract_strided_slice %91 {offsets = [0, 128], sizes = [8, 64], strides = [1, 1]} : vector<8x256xf32> to vector<8x64xf32>
    %104 = arith.mulf %100, %103 : vector<8x64xf32>
    %105 = arith.addf %102, %104 : vector<8x64xf32>
    %106 = math.tanh %105 : vector<8x64xf32>
    %cst_17 = arith.constant 1.000000e+00 : f32
    %107 = vector.broadcast %cst_17 : f32 to vector<8x64xf32>
    %108 = arith.subf %107, %101 : vector<8x64xf32>
    %109 = arith.mulf %108, %106 : vector<8x64xf32>
    %110 = arith.mulf %101, %88 : vector<8x64xf32>
    %111 = arith.addf %109, %110 : vector<8x64xf32>
    %112 = vector.extract_strided_slice %18 {offsets = [32, 0], sizes = [8, 256], strides = [1, 1]} : vector<64x256xf32> to vector<8x256xf32>
    %cst_18 = arith.constant dense<0.000000e+00> : vector<8x256xf32>
    %113 = tpu.matmul %111, %0, %cst_18 {dimension_numbers = #tpu.dot_dimension_numbers<[1], [0], [0], [1], [0, 0, 1, 1], [], []>} : vector<8x64xf32>, vector<64x256xf32>, vector<8x256xf32> -> vector<8x256xf32>
    %114 = arith.addf %113, %3 : vector<8x256xf32>
    %115 = vector.extract_strided_slice %112 {offsets = [0, 0], sizes = [8, 128], strides = [1, 1]} : vector<8x256xf32> to vector<8x128xf32>
    %116 = vector.extract_strided_slice %114 {offsets = [0, 0], sizes = [8, 128], strides = [1, 1]} : vector<8x256xf32> to vector<8x128xf32>
    %117 = arith.addf %115, %116 : vector<8x128xf32>
    %118 = arith.negf %117 : vector<8x128xf32>
    %119 = math.exp %118 : vector<8x128xf32>
    %cst_19 = arith.constant 1.000000e+00 : f32
    %120 = vector.broadcast %cst_19 : f32 to vector<8x128xf32>
    %121 = arith.addf %120, %119 : vector<8x128xf32>
    %122 = arith.divf %120, %121 : vector<8x128xf32>
    %123 = vector.extract_strided_slice %122 {offsets = [0, 0], sizes = [8, 64], strides = [1, 1]} : vector<8x128xf32> to vector<8x64xf32>
    %124 = vector.extract_strided_slice %122 {offsets = [0, 64], sizes = [8, 64], strides = [1, 1]} : vector<8x128xf32> to vector<8x64xf32>
    %125 = vector.extract_strided_slice %112 {offsets = [0, 128], sizes = [8, 64], strides = [1, 1]} : vector<8x256xf32> to vector<8x64xf32>
    %126 = vector.extract_strided_slice %114 {offsets = [0, 128], sizes = [8, 64], strides = [1, 1]} : vector<8x256xf32> to vector<8x64xf32>
    %127 = arith.mulf %123, %126 : vector<8x64xf32>
    %128 = arith.addf %125, %127 : vector<8x64xf32>
    %129 = math.tanh %128 : vector<8x64xf32>
    %cst_20 = arith.constant 1.000000e+00 : f32
    %130 = vector.broadcast %cst_20 : f32 to vector<8x64xf32>
    %131 = arith.subf %130, %124 : vector<8x64xf32>
    %132 = arith.mulf %131, %129 : vector<8x64xf32>
    %133 = arith.mulf %124, %111 : vector<8x64xf32>
    %134 = arith.addf %132, %133 : vector<8x64xf32>
    %135 = vector.extract_strided_slice %18 {offsets = [40, 0], sizes = [8, 256], strides = [1, 1]} : vector<64x256xf32> to vector<8x256xf32>
    %cst_21 = arith.constant dense<0.000000e+00> : vector<8x256xf32>
    %136 = tpu.matmul %134, %0, %cst_21 {dimension_numbers = #tpu.dot_dimension_numbers<[1], [0], [0], [1], [0, 0, 1, 1], [], []>} : vector<8x64xf32>, vector<64x256xf32>, vector<8x256xf32> -> vector<8x256xf32>
    %137 = arith.addf %136, %3 : vector<8x256xf32>
    %138 = vector.extract_strided_slice %135 {offsets = [0, 0], sizes = [8, 128], strides = [1, 1]} : vector<8x256xf32> to vector<8x128xf32>
    %139 = vector.extract_strided_slice %137 {offsets = [0, 0], sizes = [8, 128], strides = [1, 1]} : vector<8x256xf32> to vector<8x128xf32>
    %140 = arith.addf %138, %139 : vector<8x128xf32>
    %141 = arith.negf %140 : vector<8x128xf32>
    %142 = math.exp %141 : vector<8x128xf32>
    %cst_22 = arith.constant 1.000000e+00 : f32
    %143 = vector.broadcast %cst_22 : f32 to vector<8x128xf32>
    %144 = arith.addf %143, %142 : vector<8x128xf32>
    %145 = arith.divf %143, %144 : vector<8x128xf32>
    %146 = vector.extract_strided_slice %145 {offsets = [0, 0], sizes = [8, 64], strides = [1, 1]} : vector<8x128xf32> to vector<8x64xf32>
    %147 = vector.extract_strided_slice %145 {offsets = [0, 64], sizes = [8, 64], strides = [1, 1]} : vector<8x128xf32> to vector<8x64xf32>
    %148 = vector.extract_strided_slice %135 {offsets = [0, 128], sizes = [8, 64], strides = [1, 1]} : vector<8x256xf32> to vector<8x64xf32>
    %149 = vector.extract_strided_slice %137 {offsets = [0, 128], sizes = [8, 64], strides = [1, 1]} : vector<8x256xf32> to vector<8x64xf32>
    %150 = arith.mulf %146, %149 : vector<8x64xf32>
    %151 = arith.addf %148, %150 : vector<8x64xf32>
    %152 = math.tanh %151 : vector<8x64xf32>
    %cst_23 = arith.constant 1.000000e+00 : f32
    %153 = vector.broadcast %cst_23 : f32 to vector<8x64xf32>
    %154 = arith.subf %153, %147 : vector<8x64xf32>
    %155 = arith.mulf %154, %152 : vector<8x64xf32>
    %156 = arith.mulf %147, %134 : vector<8x64xf32>
    %157 = arith.addf %155, %156 : vector<8x64xf32>
    %158 = vector.extract_strided_slice %18 {offsets = [48, 0], sizes = [8, 256], strides = [1, 1]} : vector<64x256xf32> to vector<8x256xf32>
    %cst_24 = arith.constant dense<0.000000e+00> : vector<8x256xf32>
    %159 = tpu.matmul %157, %0, %cst_24 {dimension_numbers = #tpu.dot_dimension_numbers<[1], [0], [0], [1], [0, 0, 1, 1], [], []>} : vector<8x64xf32>, vector<64x256xf32>, vector<8x256xf32> -> vector<8x256xf32>
    %160 = arith.addf %159, %3 : vector<8x256xf32>
    %161 = vector.extract_strided_slice %158 {offsets = [0, 0], sizes = [8, 128], strides = [1, 1]} : vector<8x256xf32> to vector<8x128xf32>
    %162 = vector.extract_strided_slice %160 {offsets = [0, 0], sizes = [8, 128], strides = [1, 1]} : vector<8x256xf32> to vector<8x128xf32>
    %163 = arith.addf %161, %162 : vector<8x128xf32>
    %164 = arith.negf %163 : vector<8x128xf32>
    %165 = math.exp %164 : vector<8x128xf32>
    %cst_25 = arith.constant 1.000000e+00 : f32
    %166 = vector.broadcast %cst_25 : f32 to vector<8x128xf32>
    %167 = arith.addf %166, %165 : vector<8x128xf32>
    %168 = arith.divf %166, %167 : vector<8x128xf32>
    %169 = vector.extract_strided_slice %168 {offsets = [0, 0], sizes = [8, 64], strides = [1, 1]} : vector<8x128xf32> to vector<8x64xf32>
    %170 = vector.extract_strided_slice %168 {offsets = [0, 64], sizes = [8, 64], strides = [1, 1]} : vector<8x128xf32> to vector<8x64xf32>
    %171 = vector.extract_strided_slice %158 {offsets = [0, 128], sizes = [8, 64], strides = [1, 1]} : vector<8x256xf32> to vector<8x64xf32>
    %172 = vector.extract_strided_slice %160 {offsets = [0, 128], sizes = [8, 64], strides = [1, 1]} : vector<8x256xf32> to vector<8x64xf32>
    %173 = arith.mulf %169, %172 : vector<8x64xf32>
    %174 = arith.addf %171, %173 : vector<8x64xf32>
    %175 = math.tanh %174 : vector<8x64xf32>
    %cst_26 = arith.constant 1.000000e+00 : f32
    %176 = vector.broadcast %cst_26 : f32 to vector<8x64xf32>
    %177 = arith.subf %176, %170 : vector<8x64xf32>
    %178 = arith.mulf %177, %175 : vector<8x64xf32>
    %179 = arith.mulf %170, %157 : vector<8x64xf32>
    %180 = arith.addf %178, %179 : vector<8x64xf32>
    %181 = vector.extract_strided_slice %18 {offsets = [56, 0], sizes = [8, 256], strides = [1, 1]} : vector<64x256xf32> to vector<8x256xf32>
    %cst_27 = arith.constant dense<0.000000e+00> : vector<8x256xf32>
    %182 = tpu.matmul %180, %0, %cst_27 {dimension_numbers = #tpu.dot_dimension_numbers<[1], [0], [0], [1], [0, 0, 1, 1], [], []>} : vector<8x64xf32>, vector<64x256xf32>, vector<8x256xf32> -> vector<8x256xf32>
    %183 = arith.addf %182, %3 : vector<8x256xf32>
    %184 = vector.extract_strided_slice %181 {offsets = [0, 0], sizes = [8, 128], strides = [1, 1]} : vector<8x256xf32> to vector<8x128xf32>
    %185 = vector.extract_strided_slice %183 {offsets = [0, 0], sizes = [8, 128], strides = [1, 1]} : vector<8x256xf32> to vector<8x128xf32>
    %186 = arith.addf %184, %185 : vector<8x128xf32>
    %187 = arith.negf %186 : vector<8x128xf32>
    %188 = math.exp %187 : vector<8x128xf32>
    %cst_28 = arith.constant 1.000000e+00 : f32
    %189 = vector.broadcast %cst_28 : f32 to vector<8x128xf32>
    %190 = arith.addf %189, %188 : vector<8x128xf32>
    %191 = arith.divf %189, %190 : vector<8x128xf32>
    %192 = vector.extract_strided_slice %191 {offsets = [0, 0], sizes = [8, 64], strides = [1, 1]} : vector<8x128xf32> to vector<8x64xf32>
    %193 = vector.extract_strided_slice %191 {offsets = [0, 64], sizes = [8, 64], strides = [1, 1]} : vector<8x128xf32> to vector<8x64xf32>
    %194 = vector.extract_strided_slice %181 {offsets = [0, 128], sizes = [8, 64], strides = [1, 1]} : vector<8x256xf32> to vector<8x64xf32>
    %195 = vector.extract_strided_slice %183 {offsets = [0, 128], sizes = [8, 64], strides = [1, 1]} : vector<8x256xf32> to vector<8x64xf32>
    %196 = arith.mulf %192, %195 : vector<8x64xf32>
    %197 = arith.addf %194, %196 : vector<8x64xf32>
    %198 = math.tanh %197 : vector<8x64xf32>
    %cst_29 = arith.constant 1.000000e+00 : f32
    %199 = vector.broadcast %cst_29 : f32 to vector<8x64xf32>
    %200 = arith.subf %199, %193 : vector<8x64xf32>
    %201 = arith.mulf %200, %198 : vector<8x64xf32>
    %202 = arith.mulf %193, %180 : vector<8x64xf32>
    %203 = arith.addf %201, %202 : vector<8x64xf32>
    %c192 = arith.constant 192 : index
    %c0_30 = arith.constant 0 : index
    %204 = vector.load %arg1[%c192, %c0_30] : memref<264x256xf32, #tpu.memory_space<vmem>>, vector<64x128xf32>
    %c257 = arith.constant 257 : index
    %c0_31 = arith.constant 0 : index
    %205 = vector.load %arg1[%c257, %c0_31] : memref<264x256xf32, #tpu.memory_space<vmem>>, vector<1x128xf32>
    %cst_32 = arith.constant dense<0.000000e+00> : vector<8x128xf32>
    %206 = tpu.matmul %203, %204, %cst_32 {dimension_numbers = #tpu.dot_dimension_numbers<[1], [0], [0], [1], [0, 0, 1, 1], [], []>} : vector<8x64xf32>, vector<64x128xf32>, vector<8x128xf32> -> vector<8x128xf32>
    %207 = vector.broadcast %205 : vector<1x128xf32> to vector<8x128xf32>
    %208 = arith.addf %206, %207 : vector<8x128xf32>
    %c0_33 = arith.constant 0 : index
    %c0_34 = arith.constant 0 : index
    %209 = vector.load %arg2[%c0_33, %c0_34] : memref<8x128xf32, #tpu.memory_space<vmem>>, vector<8x128xf32>
    tpu.vector_store %arg2[%c0_33, %c0_34], %208 {strides = array<i32>} : memref<8x128xf32, #tpu.memory_space<vmem>>, vector<8x128xf32>,
    return
  }
}

</mosaic_0001>

<bundles_post_ra>
// kernel: tpu_custom_call.1
= control target key start
LH: loop header
LB: loop body
LE: loop exit
PB: predicated region body
PF: predicated region fallthrough
CT: control target
= control target key end

     0   :  { %7 = vsyncpa [#allocation3], 0  ;;  %s1788_s0 = inlined_call_operand.vmem [shape: s32[64,2], index: 0, kind: input, shape index: {}]   ;;  %s1789_s1 = inlined_call_operand.hbm [shape: f32[264,256], index: 1, kind: input, shape index: {}]   ;;  %s1790_s2 = inlined_call_operand.hbm [shape: f32[8,128], index: 2, kind: output, shape index: {}]  }
   0x1   :  { %8 = vsyncpa [#allocation4], 0  ;;  %s1508_s9 = smov [#allocation2]   ;;  %s1460_s13 = scalar_lea.hbm %s1789_s1, 8448 }
   0x2   :  { %s16_s10 = sshll.u32 %s1508_s9, 4  ;;  %p1461_p0 = scmp.ne.s32.totalorder %s1789_s1, %s1460_s13  ;;  %s17_s10 = int_to_ptr.vmem [resolvable:$true] %s16_s10 }
   0x3   :  { %p1464_p1 = scmp.lt.u32.totalorder %s1460_s13, %s1789_s1 }
   0x5   :  { %p1466_p2 = pnand %p1464_p1, %p1461_p0 }
   0x7   :  { %1469 = shalt.err (!%p1466_p2)
}
   0x8   :  { %s1470_s18 = scalar_lea.vmem %s17_s10, 8448  ;;  %p1475_p4 = scmp.lt.s32.totalorder %s17_s10, %s17_s10 }
   0x9   :  { %p1471_p3 = scmp.ne.s32.totalorder %s17_s10, %s1470_s18  ;;  %p1476_p5 = scmp.lt.s32.totalorder %s1470_s18, %s1470_s18 }
   0xb   :  { %p1477_p6 = por %p1476_p5, %p1475_p4 }
   0xd   :  { %p1478_p7 = pnand %p1477_p6, %p1471_p3 }
   0xf   :  { %1481 = shalt.err (!%p1478_p7)
}
  0x10   :  { %s1509_s19 = smov 256   ;;  %s1510_s20 = smov 16  }
  0x11   :  { %22 = dma.hbm_to_vmem [thread:$0]  %s1789_s1, 8448, %s17_s10, [#allocation3], %s1509_s19, %s1509_s19, %s1510_s20  }
  0x12   :  { %1504 = dma.done.wait [#allocation3], 8448  }
  0x13   :  { %1505 = vsyncadd [#allocation3], 4294958848  ;;  %v1511_v0 = vmov 0   ;;  %v55_v1 = vld [vmem:[%s1788_s0] sm:$0xff]  ;;  %v162_v2 = vld [vmem:[#allocation2 + $0x8] sm:$0xff]  ;;  %v1512_v13 = vmov 0.0  }
  0x14   :  { %1400 = vset.pattern.permute.xlu0 %v1511_v0  ;;  %1402 = vset.pattern.permute.xlu1 %v1511_v0  ;;  %v164_v3 = vld [vmem:[#allocation2 + $0x18] sm:$0xff]  ;;  %v161_v5 = vld [vmem:[#allocation2] sm:$0xff]  ;;  %v163_v6 = vld [vmem:[#allocation2 + $0x10] sm:$0xff]  ;;  %v97_v8 = vadd.s32 64, %v55_v1  ;;  %v1513_v20 = vmov 1   ;;  %s1515_s1 = smov 64  }
  0x15   :  { %66 = vperm.xlu0 %1400, %v55_v1   ;;  %v1217_v4 = vpack.c.bf16 %v164_v3, %v162_v2  ;;  %v166_v7 = vld [vmem:[#allocation2 + $0x28] sm:$0xff]  ;;  %v1219_v9 = vpack.c.bf16 %v163_v6, %v161_v5  ;;  %v168_v10 = vld [vmem:[#allocation2 + $0x38] sm:$0xff]  ;;  %v165_v11 = vld [vmem:[#allocation2 + $0x20] sm:$0xff]  ;;  %374 = vmatprep.mubr.f32.mxu1 %v1512_v13  ;;  %vm306_vm6 = vcmask 523264  }
  0x16   :  { %v167_v12 = vld [vmem:[#allocation2 + $0x30] sm:$0xff]  ;;  %257 = vmatprep.mubr.f32.mxu0 %v1512_v13  ;;  %v1221_v14 = vpack.c.bf16 %v168_v10, %v166_v7  ;;  %v170_v15 = vld [vmem:[#allocation2 + $0x48] sm:$0xff]  ;;  %v172_v16 = vld [vmem:[#allocation2 + $0x58] sm:$0xff] }
  0x17   :  { %1218 = vmatprep.subr.bf16.mxu0 %v1217_v4  ;;  %v1223_v17 = vpack.c.bf16 %v167_v12, %v165_v11  ;;  %v169_v18 = vld [vmem:[#allocation2 + $0x40] sm:$0xff]  ;;  %v171_v19 = vld [vmem:[#allocation2 + $0x50] sm:$0xff]  ;;  %v1225_v21 = vpack.c.bf16 %v172_v16, %v170_v15  ;;  %v174_v22 = vld [vmem:[#allocation2 + $0x68] sm:$0xff]  ;;  %v45_v15 = vlaneseq }
  0x18   :  { %1220 = vmatpush1.bf16.msra.mxu0 %v1219_v9  ;;  %v176_v23 = vld [vmem:[#allocation2 + $0x78] sm:$0xff]  ;;  %v27_v24 = vld [vmem:[#allocation2 + $0x108] sm:$0xff]  ;;  %v26_v26 = vld [vmem:[#allocation2 + $0x100] sm:$0xff]  ;;  %v1227_v30 = vpack.c.bf16 %v171_v19, %v169_v18  ;;  %v1514_v19 = vmov 1.0  }
  0x19   :  { %1401 = vset.pattern.permute.xlu0 %v1513_v20  ;;  %1222 = vmatprep.subr.bf16.mxu0 %v1221_v14  ;;  %v29_v25 = vld [vmem:[#allocation2 + $0x118] sm:$0xff]  ;;  %v28_v27 = vld [vmem:[#allocation2 + $0x110] sm:$0xff]  ;;  %v173_v31 = vld [vmem:[#allocation2 + $0x60] sm:$0xff]  ;;  %v1229_v34 = vpack.c.bf16 %v176_v23, %v174_v22  ;;  %v46_v23 = vshrl.u32 %v45_v15, 7 }
  0x1a   :  { %106 = vperm.xlu0 %1401, %v97_v8   ;;  %v1554_v28 = vpack.c.bf16 %v29_v25, %v27_v24  ;;  %v1556_v29 = vpack.c.bf16 %v28_v27, %v26_v26  ;;  %v31_v32 = vld [vmem:[#allocation2 + $0x128] sm:$0xff]  ;;  %v33_v33 = vld [vmem:[#allocation2 + $0x138] sm:$0xff]  ;;  %v175_v35 = vld [vmem:[#allocation2 + $0x70] sm:$0xff] }
  0x1b   :  { %v1559_v36 = vpack.c.bf16 %v33_v33, %v31_v32  ;;  %v30_v37 = vld [vmem:[#allocation2 + $0x120] sm:$0xff]  ;;  %v32_v38 = vld [vmem:[#allocation2 + $0x130] sm:$0xff]  ;;  %v178_v39 = vld [vmem:[#allocation2 + $0x88] sm:$0xff]  ;;  %v1231_v45 = vpack.c.bf16 %v175_v35, %v173_v31  ;;  %v47_v24 = vsub.s32 0, %v46_v23 }
  0x1c   :  { %1224 = vmatpush1.bf16.msra.mxu0 %v1223_v17  ;;  %1250 = vmatprep.subr.bf16.mxu1 %v1554_v28  ;;  %v180_v40 = vld [vmem:[#allocation2 + $0x98] sm:$0xff]  ;;  %v1562_v41 = vpack.c.bf16 %v32_v38, %v30_v37  ;;  %v35_v42 = vld [vmem:[#allocation2 + $0x148] sm:$0xff]  ;;  %v34_v44 = vld [vmem:[#allocation2 + $0x140] sm:$0xff]  ;;  %v1591_v17 = vand.u32 127, %v45_v15  ;;  %v51_v37 = vsub.s32 1, %v46_v23 }
  0x1d   :  { %1226 = vmatprep.subr.bf16.mxu0 %v1225_v21  ;;  %1252 = vmatpush1.bf16.msra.mxu1 %v1556_v29  ;;  %v37_v43 = vld [vmem:[#allocation2 + $0x158] sm:$0xff]  ;;  %v36_v47 = vld [vmem:[#allocation2 + $0x150] sm:$0xff]  ;;  %v1233_v48 = vpack.c.bf16 %v180_v40, %v178_v39  ;;  %v177_v49 = vld [vmem:[#allocation2 + $0x80] sm:$0xff] }
  0x1e   :  { %1404 = vset.pattern.permute.xlu0 %v1511_v0  ;;  %1254 = vmatprep.subr.bf16.mxu1 %v1559_v36  ;;  %v1566_v46 = vpack.c.bf16 %v37_v43, %v35_v42  ;;  %v179_v50 = vld [vmem:[#allocation2 + $0x90] sm:$0xff]  ;;  %v39_v51 = vld [vmem:[#allocation2 + $0x168] sm:$0xff]  ;;  %v184_v53 = vld [vmem:[#allocation2 + $0xb8] sm:$0xff]  ;;  %v1569_v54 = vpack.c.bf16 %v36_v47, %v34_v44 }
  0x1f   :  { %v182_v52 = vld [vmem:[#allocation2 + $0xa8] sm:$0xff]  ;;  %v41_v55 = vld [vmem:[#allocation2 + $0x178] sm:$0xff]  ;;  %v38_v57 = vld [vmem:[#allocation2 + $0x160] sm:$0xff]  ;;  %v1235_v59 = vpack.c.bf16 %v179_v50, %v177_v49 }
  0x20   :  { %1228 = vmatpush1.bf16.msra.mxu0 %v1227_v30  ;;  %v1572_v56 = vpack.c.bf16 %v41_v55, %v39_v51  ;;  %v40_v58 = vld [vmem:[#allocation2 + $0x170] sm:$0xff]  ;;  %v1237_v60 = vpack.c.bf16 %v184_v53, %v182_v52  ;;  %v181_v61 = vld [vmem:[#allocation2 + $0xa0] sm:$0xff]  ;;  %v186_v63 = vld [vmem:[#allocation2 + $0xc8] sm:$0xff] }
  0x21   :  { %1230 = vmatprep.subr.bf16.mxu0 %v1229_v34  ;;  %1256 = vmatpush1.bf16.msra.mxu1 %v1562_v41  ;;  %v183_v62 = vld [vmem:[#allocation2 + $0xb0] sm:$0xff]  ;;  %v188_v1 = vld [vmem:[#allocation2 + $0xd8] sm:$0xff]  ;;  %v1575_v2 = vpack.c.bf16 %v40_v58, %v38_v57  ;;  %v185_v5 = vld [vmem:[#allocation2 + $0xc0] sm:$0xff] }
  0x22   :  { %1258 = vmatprep.subr.bf16.mxu1 %v1566_v46  ;;  %v1239_v3 = vpack.c.bf16 %v183_v62, %v181_v61  ;;  %v1241_v4 = vpack.c.bf16 %v188_v1, %v186_v63  ;;  %v187_v6 = vld [vmem:[#allocation2 + $0xd0] sm:$0xff]  ;;  %v190_v7 = vld [vmem:[#allocation2 + $0xe8] sm:$0xff]  ;;  %v192_v8 = vld [vmem:[#allocation2 + $0xf8] sm:$0xff] }
  0x23   :  { %v1243_v9 = vpack.c.bf16 %v187_v6, %v185_v5  ;;  %v1245_v10 = vpack.c.bf16 %v192_v8, %v190_v7  ;;  %v189_v11 = vld [vmem:[#allocation2 + $0xe0] sm:$0xff]  ;;  %v191_v12 = vld [vmem:[#allocation2 + $0xf0] sm:$0xff] }
  0x24   :  { %1232 = vmatpush1.bf16.msra.mxu0 %v1231_v45  ;;  %v1247_v14 = vpack.c.bf16 %v191_v12, %v189_v11  ;;  %v43_v25 = vld [vmem:[#allocation2 + $0x200] ss:$8 sm:$0x3] }
  0x25   :  { %1234 = vmatprep.subr.bf16.mxu0 %v1233_v48  ;;  %1260 = vmatpush1.bf16.msra.mxu1 %v1569_v54  ;;  %v1605_v26 = vrot.slane %v43_v25, %v47_v24  ;;  %v1608_v38 = vrot.slane %v43_v25, %v51_v37  ;;  %v56_v45 = vld [vmem:[%s1788_s0 + $0x8] sm:$0xff] }
  0x26   :  { %1262 = vmatprep.subr.bf16.mxu1 %v1572_v56  ;;  %v98_v47 = vadd.s32 64, %v56_v45 }
  0x28   :  { %1236 = vmatpush1.bf16.msra.mxu0 %v1235_v59 }
  0x29   :  { %1238 = vmatprep.subr.bf16.mxu0 %v1237_v60  ;;  %1264 = vmatpush1.bf16.msra.mxu1 %v1575_v2  ;;  %v57_v60 = vld [vmem:[%s1788_s0 + $0x10] sm:$0xff] }
  0x2a   :  { %1266 = vmatprep.subr.bf16.mxu1 %v1554_v28  ;;  %v99_v11 = vadd.s32 64, %v57_v60 }
  0x2c   :  { %1240 = vmatpush1.bf16.msra.mxu0 %v1239_v3  ;;  %375 = vmatmul.mubr.f32.vlgmr.msra.gmra.mrb[0].mxu1 %v1512_v13 }
  0x2d   :  { %1242 = vmatprep.subr.bf16.mxu0 %v1241_v4  ;;  %1268 = vmatpush1.bf16.msra.mxu1 %v1556_v29 }
  0x2e   :  { %468 = vmatprep.mubr.f32.mxu1 %v1512_v13  ;;  %1270 = vmatprep.subr.bf16.mxu1 %v1559_v36 }
  0x30   :  { %1244 = vmatpush1.bf16.msra.mxu0 %v1243_v9 }
  0x31   :  { %1246 = vmatprep.subr.bf16.mxu0 %v1245_v10  ;;  %1272 = vmatpush1.bf16.msra.mxu1 %v1562_v41 }
  0x32   :  { %1274 = vmatprep.subr.bf16.mxu1 %v1566_v46 }
  0x34   :  { %1248 = vmatpush1.bf16.msra.mxu0 %v1247_v14 }
  0x35   :  { %1298 = vmatprep.subr.bf16.mxu0 %v1554_v28  ;;  %1276 = vmatpush1.bf16.msra.mxu1 %v1569_v54 }
  0x36   :  { %1278 = vmatprep.subr.bf16.mxu1 %v1572_v56 }
  0x39   :  { %1280 = vmatpush1.bf16.msra.mxu1 %v1575_v2 }
  0x3a   :  { %1282 = vmatprep.subr.bf16.mxu1 %v1554_v28 }
  0x94   :  { %v67_v16 = vpop.permute.xlu0 %66 }
  0x95   :  { %vm89_vm0 = vcmp.eq.s32.totalorder %v1591_v17, %v67_v16 }
  0x99   :  { %v107_v18 = vpop.permute.xlu0 %106 }
  0x9a   :  { %vm129_vm1 = vcmp.eq.s32.totalorder %v1591_v17, %v107_v18 }
  0x9b   :  { %vm137_vm2 = vmor %vm89_vm0, %vm129_vm1 }
  0x9c   :  { %1165 = vmatmul.mubr.msk.f32.vlgmr.msra.gmra.mrb[0].mxu0 %vm137_vm2, %v1514_v19 }
  0x9d   :  { %263 = vmatprep.mubr.f32.mxu0 %v1512_v13  ;;  %1300 = vmatpush1.bf16.msra.mxu0 %v1556_v29 }
  0x9e   :  { %1302 = vmatprep.subr.bf16.mxu0 %v1559_v36 }
  0xa1   :  { %1304 = vmatpush1.bf16.msra.mxu0 %v1562_v41 }
  0xa2   :  { %1306 = vmatprep.subr.bf16.mxu0 %v1566_v46 }
  0xa5   :  { %1308 = vmatpush1.bf16.msra.mxu0 %v1569_v54 }
  0xa6   :  { %1310 = vmatprep.subr.bf16.mxu0 %v1572_v56 }
  0xa9   :  { %1312 = vmatpush1.bf16.msra.mxu0 %v1575_v2 }
  0xaa   :  { %1330 = vmatprep.subr.bf16.mxu0 %v1554_v28 }
  0xff   :  { %v376_v21 = vpop.f32.mrb[0].mxu1 }
 0x100   :  { %v378_v22 = vpop.f32.mrb[1].mxu1  ;;  %v377_v27 = vadd.f32 %v376_v21, %v1605_v26 }
 0x101   :  { %v379_v39 = vadd.f32 %v378_v22, %v1608_v38 }
 0x16f   :  { %v259_v30 = vpop.f32.mrb[0].mxu0 }
 0x170   :  { %v381_v31 = vadd.f32 %v377_v27, %v259_v30  ;;  %v261_v32 = vpop.f32.mrb[1].mxu0  ;;  %v58_v27 = vld [vmem:[%s1788_s0 + $0x18] sm:$0xff]  ;;  %v59_v30 = vld [vmem:[%s1788_s0 + $0x20] sm:$0xff] }
 0x172   :  { %v1173_v33 = vmul.f32 -1.442695, %v381_v31  ;;  %v101_v31 = vadd.s32 64, %v59_v30 }
 0x174   :  { %1412 = vpow2.f32 %v1173_v33 }
 0x17e   :  { %v1413_v34 = vpop.eup %1412 }
 0x17f   :  { %v385_v35 = vadd.f32 1.0, %v1413_v34  ;;  %v61_v34 = vld [vmem:[%s1788_s0 + $0x30] sm:$0xff] }
 0x181   :  { %1414 = vrcp.f32 %v385_v35  ;;  %v62_v35 = vld [vmem:[%s1788_s0 + $0x38] sm:$0xff] }
 0x182   :  { %v104_v37 = vadd.s32 64, %v62_v35 }
 0x18b   :  { %v1415_v40 = vpop.eup %1414 }
 0x18c   :  { %v388_v42 = vmul.f32 %v1415_v40, %v379_v39  ;;  %v391_v48 = vsub.f32 1.0, %v1415_v40  ;;  %v397_v50 = vmul.f32 0.0, %v1415_v40 }
 0x18e   :  { %v389_v43 = vadd.f32 %v388_v42, %v261_v32  ;;  %v60_v32 = vld [vmem:[%s1788_s0 + $0x28] sm:$0xff]  ;;  %s1518_s0 = smov [#allocation5]  }
 0x18f   :  { %v102_v33 = vadd.s32 64, %v60_v32  ;;  %s1148_s11 = sshll.u32 %s1518_s0, 4  ;;  %s1149_s11 = int_to_ptr.vmem [resolvable:$true] %s1148_s11 }
 0x190   :  { %1416 = vtanh.f32 %v389_v43  ;;  %s1482_s12 = scalar_lea.vmem %s1149_s11, 128  ;;  %p1487_p9 = scmp.lt.s32.totalorder %s1149_s11, %s1149_s11 }
 0x191   :  { %p1483_p8 = scmp.ne.s32.totalorder %s1149_s11, %s1482_s12  ;;  %p1488_p10 = scmp.lt.s32.totalorder %s1482_s12, %s1482_s12 }
 0x193   :  { %p1489_p11 = por %p1488_p10, %p1487_p9 }
 0x195   :  { %p1490_p12 = pnand %p1489_p11, %p1483_p8 }
 0x19a   :  { %v1417_v44 = vpop.eup %1416 }
 0x19b   :  { %393 = vrot.lane.b32.xlu1 %v1417_v44, %s1515_s1 }
 0x19f   :  { %69 = vperm.xlu1 %1402, %v56_v45  }
 0x1a3   :  { %1403 = vset.pattern.permute.xlu1 %v1513_v20 }
 0x1a4   :  { %109 = vperm.xlu1 %1403, %v98_v47  }
 0x20d   :  { %v394_v49 = vpop.permute.xlu1 %393 }
 0x20e   :  { %v396_v51 = vmul.f32 %v394_v49, %v391_v48 }
 0x210   :  { %v398_v52 = vadd.f32 %v397_v50, %v396_v51 }
 0x212   :  { %400 = vrot.lane.b32.xlu0 %v398_v52, %s1515_s1 }
 0x216   :  { %72 = vperm.xlu0 %1404, %v57_v60  }
 0x21a   :  { %1406 = vset.pattern.permute.xlu0 %v1513_v20 }
 0x21e   :  { %v70_v53 = vpop.permute.xlu1 %69 }
 0x21f   :  { %vm90_vm3 = vcmp.eq.s32.totalorder %v1591_v17, %v70_v53  ;;  %v100_v53 = vadd.s32 64, %v58_v27 }
 0x223   :  { %v110_v55 = vpop.permute.xlu1 %109 }
 0x224   :  { %vm130_vm4 = vcmp.eq.s32.totalorder %v1591_v17, %v110_v55  ;;  %v103_v55 = vadd.s32 64, %v61_v34 }
 0x225   :  { %vm138_vm5 = vmor %vm90_vm3, %vm130_vm4 }
 0x226   :  { %1166 = vmatmul.mubr.msk.f32.gmra.mrb[2].mxu0 %vm138_vm5, %v1514_v19 }
 0x227   :  { %269 = vmatprep.mubr.f32.mxu0 %v1512_v13 }
 0x284   :  { %v401_v57 = vpop.permute.xlu0 %400 }
 0x285   :  { %1174 = vmatmul.mubr.msk.f32.vlgmr.msra.gmra.mrb[2].mxu1 %vm306_vm6, %v401_v57 }
 0x286   :  { %1284 = vmatpush1.bf16.msra.mxu1 %v1556_v29  ;;  %562 = vmatprep.mubr.f32.mxu1 %v1512_v13 }
 0x287   :  { %1286 = vmatprep.subr.bf16.mxu1 %v1559_v36 }
 0x28a   :  { %1288 = vmatpush1.bf16.msra.mxu1 %v1562_v41 }
 0x28b   :  { %1290 = vmatprep.subr.bf16.mxu1 %v1566_v46 }
 0x28e   :  { %1292 = vmatpush1.bf16.msra.mxu1 %v1569_v54 }
 0x28f   :  { %1294 = vmatprep.subr.bf16.mxu1 %v1572_v56 }
 0x292   :  { %1296 = vmatpush1.bf16.msra.mxu1 %v1575_v2 }
 0x293   :  { %1314 = vmatprep.subr.bf16.mxu1 %v1554_v28 }
 0x295   :  { %v73_v21 = vpop.permute.xlu0 %72 }
 0x296   :  { %vm91_vm7 = vcmp.eq.s32.totalorder %v1591_v17, %v73_v21 }
 0x2f9   :  { %v265_v58 = vpop.f32.mrb[2].mxu0 }
 0x2fa   :  { %v267_v59 = vpop.f32.mrb[3].mxu0 }
 0x358   :  { %v470_v61 = vpop.f32.mrb[2].mxu1 }
 0x359   :  { %v471_v62 = vadd.f32 %v470_v61, %v1605_v26  ;;  %v472_v63 = vpop.f32.mrb[3].mxu1 }
 0x35a   :  { %v473_v6 = vadd.f32 %v472_v63, %v1608_v38 }
 0x35b   :  { %v475_v1 = vadd.f32 %v471_v62, %v265_v58 }
 0x35d   :  { %v1175_v3 = vmul.f32 -1.442695, %v475_v1 }
 0x35f   :  { %1418 = vpow2.f32 %v1175_v3 }
 0x369   :  { %v1419_v4 = vpop.eup %1418 }
 0x36a   :  { %v479_v5 = vadd.f32 1.0, %v1419_v4 }
 0x36c   :  { %1420 = vrcp.f32 %v479_v5 }
 0x376   :  { %v1421_v7 = vpop.eup %1420 }
 0x377   :  { %v482_v8 = vmul.f32 %v1421_v7, %v473_v6  ;;  %v485_v12 = vsub.f32 1.0, %v1421_v7  ;;  %v491_v15 = vmul.f32 %v1421_v7, %v398_v52 }
 0x379   :  { %v483_v9 = vadd.f32 %v482_v8, %v267_v59 }
 0x37b   :  { %1422 = vtanh.f32 %v483_v9 }
 0x385   :  { %v1423_v10 = vpop.eup %1422 }
 0x386   :  { %487 = vrot.lane.b32.xlu1 %v1423_v10, %s1515_s1 }
 0x38a   :  { %112 = vperm.xlu1 %1403, %v99_v11  }
 0x38e   :  { %1405 = vset.pattern.permute.xlu1 %v1511_v0 }
 0x3f8   :  { %v488_v14 = vpop.permute.xlu1 %487 }
 0x3f9   :  { %v490_v16 = vmul.f32 %v488_v14, %v485_v12 }
 0x3fb   :  { %v1639_v18 = vadd.f32 %v491_v15, %v490_v16 }
 0x3fd   :  { %494 = vrot.lane.b32.xlu1 %v1639_v18, %s1515_s1 }
 0x401   :  { %75 = vperm.xlu1 %1405, %v58_v27  }
 0x405   :  { %78 = vperm.xlu1 %1405, %v59_v30  }
 0x409   :  { %v113_v22 = vpop.permute.xlu1 %112  ;;  %1407 = vset.pattern.permute.xlu1 %v1513_v20 }
 0x40a   :  { %vm131_vm8 = vcmp.eq.s32.totalorder %v1591_v17, %v113_v22  ;;  %118 = vperm.xlu1 %1407, %v101_v31  }
 0x40b   :  { %vm139_vm9 = vmor %vm91_vm7, %vm131_vm8 }
 0x40c   :  { %1167 = vmatmul.mubr.msk.f32.gmra.mrb[4].mxu0 %vm139_vm9, %v1514_v19 }
 0x40d   :  { %275 = vmatprep.mubr.f32.mxu0 %v1512_v13 }
 0x40e   :  { %121 = vperm.xlu1 %1407, %v102_v33  }
 0x412   :  { %1409 = vset.pattern.permute.xlu1 %v1511_v0 }
 0x413   :  { %84 = vperm.xlu1 %1409, %v61_v34  }
 0x417   :  { %87 = vperm.xlu1 %1409, %v62_v35  }
 0x41b   :  { %1411 = vset.pattern.permute.xlu1 %v1513_v20 }
 0x41c   :  { %127 = vperm.xlu1 %1411, %v104_v37  }
 0x46f   :  { %v495_v23 = vpop.permute.xlu1 %494 }
 0x470   :  { %1176 = vmatmul.mubr.msk.f32.vlgmr.msra.gmra.mrb[4].mxu1 %vm306_vm6, %v495_v23 }
 0x471   :  { %1316 = vmatpush1.bf16.msra.mxu1 %v1556_v29  ;;  %750 = vmatprep.mubr.f32.mxu1 %v1512_v13 }
 0x472   :  { %1318 = vmatprep.subr.bf16.mxu1 %v1559_v36 }
 0x475   :  { %1320 = vmatpush1.bf16.msra.mxu1 %v1562_v41 }
 0x476   :  { %1322 = vmatprep.subr.bf16.mxu1 %v1566_v46 }
 0x479   :  { %1324 = vmatpush1.bf16.msra.mxu1 %v1569_v54 }
 0x47a   :  { %1326 = vmatprep.subr.bf16.mxu1 %v1572_v56 }
 0x47d   :  { %1328 = vmatpush1.bf16.msra.mxu1 %v1575_v2 }
 0x47e   :  { %1346 = vmatprep.subr.bf16.mxu1 %v1554_v28 }
 0x480   :  { %v76_v57 = vpop.permute.xlu1 %75 }
 0x481   :  { %vm92_vm10 = vcmp.eq.s32.totalorder %v1591_v17, %v76_v57 }
 0x484   :  { %v79_v59 = vpop.permute.xlu1 %78 }
 0x485   :  { %vm93_vm12 = vcmp.eq.s32.totalorder %v1591_v17, %v79_v59 }
 0x489   :  { %v119_v1 = vpop.permute.xlu1 %118 }
 0x48a   :  { %vm133_vm13 = vcmp.eq.s32.totalorder %v1591_v17, %v119_v1 }
 0x48b   :  { %vm141_vm15 = vmor %vm93_vm12, %vm133_vm13 }
 0x48d   :  { %v122_v3 = vpop.permute.xlu1 %121 }
 0x48e   :  { %vm134_vm0 = vcmp.eq.s32.totalorder %v1591_v17, %v122_v3 }
 0x4df   :  { %v271_v24 = vpop.f32.mrb[4].mxu0 }
 0x4e0   :  { %v273_v25 = vpop.f32.mrb[5].mxu0 }
 0x543   :  { %v564_v39 = vpop.f32.mrb[4].mxu1 }
 0x544   :  { %v565_v40 = vadd.f32 %v564_v39, %v1605_v26  ;;  %v566_v42 = vpop.f32.mrb[5].mxu1 }
 0x545   :  { %v567_v48 = vadd.f32 %v566_v42, %v1608_v38 }
 0x546   :  { %v569_v43 = vadd.f32 %v565_v40, %v271_v24 }
 0x548   :  { %v1177_v44 = vmul.f32 -1.442695, %v569_v43 }
 0x54a   :  { %1424 = vpow2.f32 %v1177_v44 }
 0x554   :  { %v1425_v45 = vpop.eup %1424 }
 0x555   :  { %v573_v47 = vadd.f32 1.0, %v1425_v45 }
 0x557   :  { %1426 = vrcp.f32 %v573_v47 }
 0x561   :  { %v1427_v49 = vpop.eup %1426 }
 0x562   :  { %v576_v50 = vmul.f32 %v1427_v49, %v567_v48  ;;  %v579_v58 = vsub.f32 1.0, %v1427_v49  ;;  %v585_v61 = vmul.f32 %v1427_v49, %v1639_v18 }
 0x564   :  { %v577_v51 = vadd.f32 %v576_v50, %v273_v25 }
 0x566   :  { %1428 = vtanh.f32 %v577_v51 }
 0x570   :  { %v1429_v52 = vpop.eup %1428 }
 0x571   :  { %581 = vrot.lane.b32.xlu0 %v1429_v52, %s1515_s1 }
 0x575   :  { %115 = vperm.xlu0 %1406, %v100_v53  }
 0x579   :  { %1408 = vset.pattern.permute.xlu0 %v1511_v0  ;;  %v85_v0 = vpop.permute.xlu1 %84 }
 0x57a   :  { %81 = vperm.xlu0 %1408, %v60_v32   ;;  %vm95_vm3 = vcmp.eq.s32.totalorder %v1591_v17, %v85_v0 }
 0x57e   :  { %1410 = vset.pattern.permute.xlu0 %v1513_v20  ;;  %v88_v20 = vpop.permute.xlu1 %87 }
 0x57f   :  { %124 = vperm.xlu0 %1410, %v103_v55   ;;  %vm96_vm7 = vcmp.eq.s32.totalorder %v1591_v17, %v88_v20 }
 0x582   :  { %v128_v7 = vpop.permute.xlu1 %127 }
 0x583   :  { %vm136_vm8 = vcmp.eq.s32.totalorder %v1591_v17, %v128_v7 }
 0x584   :  { %vm144_vm9 = vmor %vm96_vm7, %vm136_vm8 }
 0x5e3   :  { %v582_v60 = vpop.permute.xlu0 %581 }
 0x5e4   :  { %v584_v62 = vmul.f32 %v582_v60, %v579_v58 }
 0x5e6   :  { %v1681_v63 = vadd.f32 %v585_v61, %v584_v62 }
 0x5e8   :  { %588 = vrot.lane.b32.xlu0 %v1681_v63, %s1515_s1 }
 0x5f4   :  { %v116_v4 = vpop.permute.xlu0 %115 }
 0x5f5   :  { %vm132_vm11 = vcmp.eq.s32.totalorder %v1591_v17, %v116_v4 }
 0x5f6   :  { %vm140_vm14 = vmor %vm92_vm10, %vm132_vm11  ;;  %vm1517_vm10 = vmmov 0  }
 0x5f7   :  { %1168 = vmatmul.mubr.msk.f32.gmra.mrb[6].mxu0 %vm140_vm14, %v1514_v19 }
 0x5f8   :  { %281 = vmatprep.mubr.f32.mxu0 %v1512_v13 }
 0x5f9   :  { %v82_v5 = vpop.permute.xlu0 %81 }
 0x5fa   :  { %vm94_vm1 = vcmp.eq.s32.totalorder %v1591_v17, %v82_v5 }
 0x5fb   :  { %1169 = vmatmul.mubr.msk.f32.gmra.mrb[8].mxu0 %vm141_vm15, %v1514_v19  ;;  %vm142_vm2 = vmor %vm94_vm1, %vm134_vm0 }
 0x5fc   :  { %287 = vmatprep.mubr.f32.mxu0 %v1512_v13 }
 0x5fe   :  { %v125_v6 = vpop.permute.xlu0 %124 }
 0x5ff   :  { %1170 = vmatmul.mubr.msk.f32.gmra.mrb[10].mxu0 %vm142_vm2, %v1514_v19  ;;  %vm135_vm4 = vcmp.eq.s32.totalorder %v1591_v17, %v125_v6 }
 0x600   :  { %vm143_vm5 = vmor %vm95_vm3, %vm135_vm4  ;;  %293 = vmatprep.mubr.f32.mxu0 %v1512_v13 }
 0x603   :  { %1171 = vmatmul.mubr.msk.f32.gmra.mrb[12].mxu0 %vm143_vm5, %v1514_v19 }
 0x604   :  { %299 = vmatprep.mubr.f32.mxu0 %v1512_v13 }
 0x607   :  { %1172 = vmatmul.mubr.msk.f32.gmra.mrb[14].mxu0 %vm144_vm9, %v1514_v19 }
 0x608   :  { %656 = vmatprep.mubr.f32.mxu0 %v1512_v13 }
 0x65a   :  { %v589_v8 = vpop.permute.xlu0 %588 }
 0x65b   :  { %1178 = vmatmul.mubr.msk.f32.vlgmr.msra.gmra.mrb[16].mxu0 %vm306_vm6, %v589_v8 }
 0x65c   :  { %1332 = vmatpush1.bf16.msra.mxu0 %v1556_v29  ;;  %844 = vmatprep.mubr.f32.mxu0 %v1512_v13 }
 0x65d   :  { %1334 = vmatprep.subr.bf16.mxu0 %v1559_v36 }
 0x660   :  { %1336 = vmatpush1.bf16.msra.mxu0 %v1562_v41 }
 0x661   :  { %1338 = vmatprep.subr.bf16.mxu0 %v1566_v46 }
 0x664   :  { %1340 = vmatpush1.bf16.msra.mxu0 %v1569_v54 }
 0x665   :  { %1342 = vmatprep.subr.bf16.mxu0 %v1572_v56 }
 0x668   :  { %1344 = vmatpush1.bf16.msra.mxu0 %v1575_v2 }
 0x669   :  { %1362 = vmatprep.subr.bf16.mxu0 %v1554_v28 }
 0x6ca   :  { %v277_v17 = vpop.f32.mrb[6].mxu0 }
 0x6cb   :  { %v279_v19 = vpop.f32.mrb[7].mxu0 }
 0x6ce   :  { %v283_v9 = vpop.f32.mrb[8].mxu0 }
 0x6cf   :  { %v285_v10 = vpop.f32.mrb[9].mxu0 }
 0x6d2   :  { %v1715_v11 = vpop.f32.mrb[10].mxu0 }
 0x6d3   :  { %v1717_v12 = vpop.f32.mrb[11].mxu0 }
 0x6d6   :  { %v1719_v14 = vpop.f32.mrb[12].mxu0 }
 0x6d7   :  { %v1721_v15 = vpop.f32.mrb[13].mxu0 }
 0x6da   :  { %v1723_v16 = vpop.f32.mrb[14].mxu0 }
 0x6db   :  { %v1725_v18 = vpop.f32.mrb[15].mxu0 }
 0x72e   :  { %v658_v21 = vpop.f32.mrb[16].mxu0 }
 0x72f   :  { %v659_v22 = vadd.f32 %v658_v21, %v1605_v26  ;;  %v660_v28 = vpop.f32.mrb[17].mxu0 }
 0x730   :  { %v661_v30 = vadd.f32 %v660_v28, %v1608_v38 }
 0x731   :  { %v663_v23 = vadd.f32 %v659_v22, %v277_v17 }
 0x733   :  { %v1179_v24 = vmul.f32 -1.442695, %v663_v23 }
 0x735   :  { %1430 = vpow2.f32 %v1179_v24 }
 0x73f   :  { %v1431_v25 = vpop.eup %1430 }
 0x740   :  { %v667_v27 = vadd.f32 1.0, %v1431_v25 }
 0x742   :  { %1432 = vrcp.f32 %v667_v27 }
 0x74c   :  { %v1433_v31 = vpop.eup %1432 }
 0x74d   :  { %v670_v32 = vmul.f32 %v1433_v31, %v661_v30  ;;  %v673_v35 = vsub.f32 1.0, %v1433_v31  ;;  %v679_v39 = vmul.f32 %v1433_v31, %v1681_v63 }
 0x74f   :  { %v671_v33 = vadd.f32 %v670_v32, %v279_v19 }
 0x751   :  { %1434 = vtanh.f32 %v671_v33 }
 0x75b   :  { %v1435_v34 = vpop.eup %1434 }
 0x75c   :  { %675 = vrot.lane.b32.xlu1 %v1435_v34, %s1515_s1 }
 0x7ce   :  { %v676_v37 = vpop.permute.xlu1 %675 }
 0x7cf   :  { %v678_v40 = vmul.f32 %v676_v37, %v673_v35 }
 0x7d1   :  { %v680_v42 = vadd.f32 %v679_v39, %v678_v40 }
 0x7d3   :  { %682 = vrot.lane.b32.xlu0 %v680_v42, %s1515_s1 }
 0x845   :  { %v683_v43 = vpop.permute.xlu0 %682 }
 0x846   :  { %1180 = vmatmul.mubr.msk.f32.vlgmr.msra.gmra.mrb[6].mxu1 %vm306_vm6, %v683_v43 }
 0x847   :  { %1348 = vmatpush1.bf16.msra.mxu1 %v1556_v29  ;;  %938 = vmatprep.mubr.f32.mxu1 %v1512_v13 }
 0x848   :  { %1350 = vmatprep.subr.bf16.mxu1 %v1559_v36 }
 0x84b   :  { %1352 = vmatpush1.bf16.msra.mxu1 %v1562_v41 }
 0x84c   :  { %1354 = vmatprep.subr.bf16.mxu1 %v1566_v46 }
 0x84f   :  { %1356 = vmatpush1.bf16.msra.mxu1 %v1569_v54 }
 0x850   :  { %1358 = vmatprep.subr.bf16.mxu1 %v1572_v56 }
 0x853   :  { %1360 = vmatpush1.bf16.msra.mxu1 %v1575_v2 }
 0x919   :  { %v752_v44 = vpop.f32.mrb[6].mxu1 }
 0x91a   :  { %v753_v45 = vadd.f32 %v752_v44, %v1605_v26  ;;  %v754_v47 = vpop.f32.mrb[7].mxu1 }
 0x91b   :  { %v755_v52 = vadd.f32 %v754_v47, %v1608_v38 }
 0x91c   :  { %v757_v48 = vadd.f32 %v753_v45, %v283_v9 }
 0x91e   :  { %v1181_v49 = vmul.f32 -1.442695, %v757_v48 }
 0x920   :  { %1436 = vpow2.f32 %v1181_v49 }
 0x92a   :  { %v1437_v50 = vpop.eup %1436 }
 0x92b   :  { %v761_v51 = vadd.f32 1.0, %v1437_v50 }
 0x92d   :  { %1438 = vrcp.f32 %v761_v51  ;;  %v1057_v51 = vld [vmem:[#allocation2 + $0x180] sm:$0xff] }
 0x937   :  { %v1439_v53 = vpop.eup %1438 }
 0x938   :  { %v764_v55 = vmul.f32 %v1439_v53, %v755_v52  ;;  %v767_v59 = vsub.f32 1.0, %v1439_v53  ;;  %v773_v61 = vmul.f32 %v1439_v53, %v680_v42  ;;  %v1058_v52 = vld [vmem:[#allocation2 + $0x190] sm:$0xff]  ;;  %v1059_v53 = vld [vmem:[#allocation2 + $0x1a0] sm:$0xff] }
 0x93a   :  { %v765_v57 = vadd.f32 %v764_v55, %v285_v10  ;;  %v1516_v55 = vmov 0.0|0.0  }
 0x93b   :  { %1377 = vmatprep.subr.bf16.mxu1 %v1516_v55 }
 0x93c   :  { %1440 = vtanh.f32 %v765_v57  ;;  %v1060_v57 = vld [vmem:[#allocation2 + $0x1b0] sm:$0xff] }
 0x946   :  { %v1441_v58 = vpop.eup %1440 }
 0x947   :  { %769 = vrot.lane.b32.xlu1 %v1441_v58, %s1515_s1  ;;  %v1061_v58 = vld [vmem:[#allocation2 + $0x1c0] sm:$0xff] }
 0x9b9   :  { %v770_v60 = vpop.permute.xlu1 %769 }
 0x9ba   :  { %v772_v62 = vmul.f32 %v770_v60, %v767_v59 }
 0x9bc   :  { %v774_v63 = vadd.f32 %v773_v61, %v772_v62  ;;  %v1064_v61 = vld [vmem:[#allocation2 + $0x1f0] sm:$0xff] }
 0x9be   :  { %776 = vrot.lane.b32.xlu0 %v774_v63, %s1515_s1 }
 0xa30   :  { %v777_v1 = vpop.permute.xlu0 %776 }
 0xa31   :  { %1182 = vmatmul.mubr.msk.f32.vlgmr.msra.gmra.mrb[18].mxu0 %vm306_vm6, %v777_v1 }
 0xa32   :  { %1364 = vmatpush1.bf16.msra.mxu0 %v1556_v29  ;;  %1032 = vmatprep.mubr.f32.mxu0 %v1512_v13 }
 0xa33   :  { %1366 = vmatprep.subr.bf16.mxu0 %v1559_v36 }
 0xa36   :  { %1368 = vmatpush1.bf16.msra.mxu0 %v1562_v41 }
 0xa37   :  { %1370 = vmatprep.subr.bf16.mxu0 %v1566_v46 }
 0xa3a   :  { %1372 = vmatpush1.bf16.msra.mxu0 %v1569_v54 }
 0xa3b   :  { %1374 = vmatprep.subr.bf16.mxu0 %v1572_v56 }
 0xa3e   :  { %1376 = vmatpush1.bf16.msra.mxu0 %v1575_v2 }
 0xb04   :  { %v846_v3 = vpop.f32.mrb[18].mxu0 }
 0xb05   :  { %v847_v0 = vadd.f32 %v846_v3, %v1605_v26  ;;  %v848_v4 = vpop.f32.mrb[19].mxu0 }
 0xb06   :  { %v849_v41 = vadd.f32 %v848_v4, %v1608_v38 }
 0xb07   :  { %v851_v29 = vadd.f32 %v847_v0, %v1715_v11 }
 0xb09   :  { %v1183_v20 = vmul.f32 -1.442695, %v851_v29  ;;  %v1065_v29 = vld [vmem:[#allocation2 + $0x201] ss:$0 sm:$0xff] }
 0xb0b   :  { %1442 = vpow2.f32 %v1183_v20 }
 0xb15   :  { %v1443_v5 = vpop.eup %1442 }
 0xb16   :  { %v855_v36 = vadd.f32 1.0, %v1443_v5 }
 0xb18   :  { %1444 = vrcp.f32 %v855_v36 }
 0xb22   :  { %v1445_v46 = vpop.eup %1444 }
 0xb23   :  { %v858_v6 = vmul.f32 %v1445_v46, %v849_v41  ;;  %v861_v2 = vsub.f32 1.0, %v1445_v46  ;;  %v867_v8 = vmul.f32 %v1445_v46, %v774_v63 }
 0xb25   :  { %v859_v54 = vadd.f32 %v858_v6, %v1717_v12 }
 0xb27   :  { %1446 = vtanh.f32 %v859_v54 }
 0xb31   :  { %v1447_v56 = vpop.eup %1446 }
 0xb32   :  { %863 = vrot.lane.b32.xlu1 %v1447_v56, %s1515_s1 }
 0xba4   :  { %v864_v7 = vpop.permute.xlu1 %863 }
 0xba5   :  { %v866_v17 = vmul.f32 %v864_v7, %v861_v2 }
 0xba7   :  { %v868_v19 = vadd.f32 %v867_v8, %v866_v17 }
 0xba9   :  { %870 = vrot.lane.b32.xlu0 %v868_v19, %s1515_s1 }
 0xc1b   :  { %v871_v9 = vpop.permute.xlu0 %870 }
 0xc1c   :  { %1184 = vmatmul.mubr.msk.f32.vlgmr.msra.gmra.mrb[8].mxu1 %vm306_vm6, %v871_v9 }
 0xc1d   :  { %1214 = vmatprep.mubr.msk.f32.mxu1 %vm1517_vm10, %v1512_v13 }
 0xcef   :  { %v940_v10 = vpop.f32.mrb[8].mxu1 }
 0xcf0   :  { %v941_v11 = vadd.f32 %v940_v10, %v1605_v26  ;;  %v942_v21 = vpop.f32.mrb[9].mxu1 }
 0xcf1   :  { %v943_v24 = vadd.f32 %v942_v21, %v1608_v38 }
 0xcf2   :  { %v945_v12 = vadd.f32 %v941_v11, %v1719_v14 }
 0xcf4   :  { %v1185_v22 = vmul.f32 -1.442695, %v945_v12 }
 0xcf6   :  { %1448 = vpow2.f32 %v1185_v22 }
 0xd00   :  { %v1449_v28 = vpop.eup %1448 }
 0xd01   :  { %v949_v23 = vadd.f32 1.0, %v1449_v28 }
 0xd03   :  { %1450 = vrcp.f32 %v949_v23 }
 0xd0d   :  { %v1451_v25 = vpop.eup %1450 }
 0xd0e   :  { %v952_v27 = vmul.f32 %v1451_v25, %v943_v24  ;;  %v955_v32 = vsub.f32 1.0, %v1451_v25  ;;  %v961_v34 = vmul.f32 %v1451_v25, %v868_v19 }
 0xd10   :  { %v953_v30 = vadd.f32 %v952_v27, %v1721_v15 }
 0xd12   :  { %1452 = vtanh.f32 %v953_v30 }
 0xd1c   :  { %v1453_v31 = vpop.eup %1452 }
 0xd1d   :  { %957 = vrot.lane.b32.xlu1 %v1453_v31, %s1515_s1 }
 0xd8f   :  { %v958_v33 = vpop.permute.xlu1 %957 }
 0xd90   :  { %v960_v35 = vmul.f32 %v958_v33, %v955_v32 }
 0xd92   :  { %v962_v14 = vadd.f32 %v961_v34, %v960_v35 }
 0xd94   :  { %964 = vrot.lane.b32.xlu0 %v962_v14, %s1515_s1 }
 0xe06   :  { %v965_v37 = vpop.permute.xlu0 %964 }
 0xe07   :  { %1186 = vmatmul.mubr.msk.f32.vlgmr.msra.gmra.mrb[20].mxu0 %vm306_vm6, %v965_v37 }
 0xeda   :  { %v1034_v39 = vpop.f32.mrb[20].mxu0 }
 0xedb   :  { %v1035_v40 = vadd.f32 %v1034_v39, %v1605_v26  ;;  %v1036_v42 = vpop.f32.mrb[21].mxu0  ;;  %v1378_v26 = vpack.c.bf16 %v1058_v52, %v1057_v51 }
 0xedc   :  { %v1037_v47 = vadd.f32 %v1036_v42, %v1608_v38  ;;  %v1062_v38 = vld [vmem:[#allocation2 + $0x1d0] sm:$0xff] }
 0xedd   :  { %v1039_v15 = vadd.f32 %v1035_v40, %v1723_v16  ;;  %1379 = vmatpush3.bf16.msra.mxu1 %v1378_v26  ;;  %v1381_v16 = vpack.c.bf16 %v1060_v57, %v1059_v53  ;;  %v1384_v59 = vpack.c.bf16 %v1062_v38, %v1061_v58 }
 0xede   :  { %1380 = vmatprep.subr.bf16.mxu1 %v1516_v55 }
 0xedf   :  { %v1187_v43 = vmul.f32 -1.442695, %v1039_v15 }
 0xee1   :  { %1454 = vpow2.f32 %v1187_v43  ;;  %1382 = vmatpush3.bf16.msra.mxu1 %v1381_v16 }
 0xee2   :  { %1383 = vmatprep.subr.bf16.mxu1 %v1516_v55 }
 0xee5   :  { %1385 = vmatpush3.bf16.msra.mxu1 %v1384_v59 }
 0xee6   :  { %1386 = vmatprep.subr.bf16.mxu1 %v1516_v55 }
 0xeeb   :  { %v1455_v44 = vpop.eup %1454 }
 0xeec   :  { %v1043_v45 = vadd.f32 1.0, %v1455_v44 }
 0xeee   :  { %1456 = vrcp.f32 %v1043_v45 }
 0xef8   :  { %v1457_v48 = vpop.eup %1456 }
 0xef9   :  { %v1046_v49 = vmul.f32 %v1457_v48, %v1037_v47  ;;  %v1049_v63 = vsub.f32 1.0, %v1457_v48  ;;  %v1055_v13 = vmul.f32 %v1457_v48, %v962_v14 }
 0xefb   :  { %v1047_v50 = vadd.f32 %v1046_v49, %v1725_v18  ;;  %v1063_v18 = vld [vmem:[#allocation2 + $0x1e0] sm:$0xff] }
 0xefc   :  { %v1387_v62 = vpack.c.bf16 %v1064_v61, %v1063_v18 }
 0xefd   :  { %1458 = vtanh.f32 %v1047_v50 }
 0xefe   :  { %1388 = vmatpush3.bf16.msra.mxu1 %v1387_v62 }
 0xf07   :  { %v1459_v60 = vpop.eup %1458 }
 0xf08   :  { %1051 = vrot.lane.b32.xlu1 %v1459_v60, %s1515_s1 }
 0xf7a   :  { %v1052_v1 = vpop.permute.xlu1 %1051 }
 0xf7b   :  { %v1054_v3 = vmul.f32 %v1052_v1, %v1049_v63 }
 0xf7d   :  { %v1056_v0 = vadd.f32 %v1055_v13, %v1054_v3 }
 0xf7f   :  { %1067 = vrot.lane.b32.xlu0 %v1056_v0, %s1515_s1 }
 0xff1   :  { %v1068_v4 = vpop.permute.xlu0 %1067 }
 0xff2   :  { %1215 = vmatmul.mubr.msk.f32.vlgmr.msra.gmra.mrb[10].mxu1 %vm306_vm6, %v1068_v4 }
0x10c5   :  { %v1137_v20 = vpop.f32.mrb[10].mxu1 }
0x10c6   :  { %v1138_v5 = vadd.f32 %v1137_v20, %v1065_v29  ;;  %v1216_v36 = vpop.f32.mrb[11].mxu1 }
0x10c8   :  { %1141 = vst [vmem:[#allocation5] sm:$0xff] %v1138_v5 }
0x10c9   :  { %1493 = shalt.err (!%p1490_p12)
}
0x10ca   :  { %s1494_s15 = scalar_lea.hbm %s1790_s2, 128 }
0x10cb   :  { %p1495_p13 = scmp.ne.s32.totalorder %s1790_s2, %s1494_s15  ;;  %p1498_p0 = scmp.lt.u32.totalorder %s1494_s15, %s1790_s2 }
0x10cd   :  { %p1500_p1 = pnand %p1498_p0, %p1495_p13 }
0x10cf   :  { %1503 = shalt.err (!%p1500_p1)
}
0x10d0   :  { %1151 = dma.vmem_to_hbm [thread:$0]  %s1149_s11, 128, %s1790_s2, [#allocation4]  }
0x10d1   :  { %1506 = dma.done.wait [#allocation4], 128  }
0x10d2   :  { %1507 = vsyncadd [#allocation4], 4294967168 }
0x10d3   :  { %1155 = vsyncpa [#allocation3], 1 }
0x10d4   :  { %1156 = vsyncpa [#allocation4], 1 }

</bundles_post_ra>
